<compile_context>
chip_gen: v7x
topology: tpu7x:2x2x1
jax: 0.10.0
libtpu: 0.0.40
codegen_flags: <defaults>
</compile_context>

<pallas_src>
import functools

import jax
import jax.numpy as jnp
from jax.experimental import pallas as pl
from jax.experimental.pallas import tpu as pltpu


# ----------------------------------------------------------------------------
# Pallas kernel: fused MLP for one (batch tile, subnet group) pair.
# ----------------------------------------------------------------------------
def _tensor_layer_kernel(n_layers, activation, *refs):
    # refs = (x_ref, w0_ref, b0_ref, ..., w_{L-1}_ref, b_{L-1}_ref, out_ref)
    x_ref = refs[0]
    out_ref = refs[-1]
    params = refs[1:-1]

    xs = x_ref[...]                                    # (bt, G*K), compute dtype
    for l in range(n_layers):
        w = params[2 * l][0]                           # (G*prev, G*hid) block-diag
        b = params[2 * l + 1][0]                       # (1, G*hid) float32
        xs = jnp.dot(xs, w, preferred_element_type=jnp.float32) + b
        if l < n_layers - 1:                           # hidden layers only
            xs = activation(xs).astype(w.dtype)        # back to MXU operand dtype
    out_ref[0] = xs.astype(out_ref.dtype)              # (bt, G)


# ----------------------------------------------------------------------------
# Packing helpers (plain JAX; can be run once offline, outside the hot path).
# ----------------------------------------------------------------------------
def _group_block_diag(w, group):
    """(S, P, H) per-subnet weights -> (S//group, group*P, group*H) slabs."""
    s, p, h = w.shape
    ng = s // group
    wg = w.reshape(ng, group, p, h)
    eye = jnp.eye(group, dtype=w.dtype)
    bd = wg[:, :, :, None, :] * eye[None, :, None, :, None]   # (ng, G, P, G, H)
    return bd.reshape(ng, group * p, group * h)                # O(S*G), not O(S^2)


def pack_tensor_layer_params(all_weights, all_biases, group,
                             compute_dtype=jnp.bfloat16):
    packed_w, packed_b = [], []
    for w, b in zip(all_weights, all_biases):
        packed_w.append(_group_block_diag(w.astype(compute_dtype), group))
        s, h = b.shape
        # biases stay f32: they are added after the f32 accumulation.
        packed_b.append(b.astype(jnp.float32).reshape(s // group, 1, group * h))
    return packed_w, packed_b


def pack_inputs(inputs, compute_dtype=jnp.bfloat16):
    """(S, B, K) -> (B, S*K) in the matmul operand dtype."""
    s, batch, k = inputs.shape
    return jnp.transpose(inputs, (1, 0, 2)).reshape(batch, s * k).astype(compute_dtype)


# ----------------------------------------------------------------------------
# Hardware-aware policy helpers.
# ----------------------------------------------------------------------------
def _vmem_capacity_bytes():
    try:
        cap = getattr(pltpu.get_tpu_info(), "vmem_capacity_bytes", None)
        if cap:
            return int(cap)
    except Exception:
        pass
    return 64 << 20                      # conservative default (v7x-sized VMEM)


def _num_tensorcores():
    # Single-TC parts (v5e / v6e) -> 1; v4 / v5p / v7x (2 TCs) and unknown -> 2.
    try:
        kind = jax.devices()[0].device_kind.lower()
        if ("v5e" in kind) or ("v5 lite" in kind) or ("v5lite" in kind) or ("v6" in kind):
            return 1
    except Exception:
        pass
    try:
        info = pltpu.get_tpu_info()
        for attr in ("num_cores", "core_count", "num_tensorcores", "tensorcore_count"):
            v = getattr(info, attr, None)
            if v:
                return int(v)
    except Exception:
        pass
    return 2


def _choose_group_size(n_subnets, n_input, layer_dims, itemsize, budget_bytes):
    def slab_bytes(g):
        return sum(itemsize * (g * p) * (g * h) for p, h in layer_dims)
    if slab_bytes(n_subnets) <= budget_bytes:
        return n_subnets                              # single fused group
    divisors = [d for d in range(1, n_subnets) if n_subnets % d == 0]
    # n_groups > 1 requires lane-aligned x blocks: (G * K) % 128 == 0.
    aligned = [d for d in divisors if (d * n_input) % 128 == 0]
    for g in sorted(aligned, reverse=True):
        if slab_bytes(g) <= budget_bytes:
            return g
    return min(aligned) if aligned else n_subnets


# ----------------------------------------------------------------------------
# Wrapper: pack, build grid/BlockSpecs, call the kernel.
# ----------------------------------------------------------------------------
def tensor_layer_forward(inputs, all_weights, all_biases, activation=jax.nn.relu,
                         batch_tile=None, group_size=None,
                         compute_dtype=jnp.bfloat16):
    """inputs: (n_subnets, batch, n_input_nodes)
       all_weights[i]: (n_subnets, prev_i, hid_i)   (last layer hid = 1)
       all_biases[i] : (n_subnets, hid_i)
       returns: (batch, n_subnets)  -- same as the PyTorch forward().
    """
    n_subnets, batch, n_input = inputs.shape
    n_layers = len(all_weights)
    layer_dims = [(int(w.shape[1]), int(w.shape[2])) for w in all_weights]
    itemsize = jnp.dtype(compute_dtype).itemsize

    vmem_cap = _vmem_capacity_bytes()
    vmem_budget_cap = (48 << 20) if vmem_cap <= (80 << 20) else (100 << 20)

    # ---- subnet grouping: parameter footprint O(S*G), not O(S^2) -----------
    if group_size is None:
        group_size = _choose_group_size(n_subnets, n_input, layer_dims,
                                        itemsize, budget_bytes=vmem_budget_cap // 8)
    if n_subnets % group_size != 0:
        raise ValueError("group_size must divide n_subnets")
    n_groups = n_subnets // group_size
    if n_groups > 1 and (group_size * n_input) % 128 != 0:
        raise ValueError("with multiple groups, group_size * n_input_nodes must "
                         "be a multiple of 128 (lane-aligned x blocks)")

    # ---- pack (could be hoisted offline via pack_* helpers) ----------------
    x = pack_inputs(inputs, compute_dtype)
    packed_w, packed_b = pack_tensor_layer_params(all_weights, all_biases,
                                                  group_size, compute_dtype)

    # ---- batch-tile policy ---------------------------------------------------
    n_cores = _num_tensorcores()
    if batch_tile is None:
        if n_cores <= 1:
            batch_tile = min(batch, 2048)             # single grid step when possible
        else:
            half = -(-batch // 2)                     # >=2 equal-ish tiles for 2 TCs
            batch_tile = min(-(-half // 8) * 8, 2048)
    batch_tile = max(1, min(int(batch_tile), batch))
    if batch_tile != batch and batch_tile % 8 != 0:
        batch_tile = min(-(-batch_tile // 8) * 8, batch)
    n_tiles = pl.cdiv(batch, batch_tile)

    # ---- BlockSpecs: grid = (batch tiles, subnet groups), both parallel -----
    in_specs = [pl.BlockSpec((batch_tile, group_size * n_input), lambda i, g: (i, g))]
    flat_params = []
    for w, b in zip(packed_w, packed_b):
        in_specs.append(pl.BlockSpec((1,) + w.shape[1:], lambda i, g: (g, 0, 0)))
        in_specs.append(pl.BlockSpec((1,) + b.shape[1:], lambda i, g: (g, 0, 0)))
        flat_params.extend([w, b])
    out_specs = pl.BlockSpec((1, batch_tile, group_size), lambda i, g: (g, i, 0))

    # ---- VMEM budget (per-chip cap; only one group slab resident at a time) --
    widths = [group_size * n_input] + [group_size * h for _, h in layer_dims]
    x_blk = itemsize * batch_tile * widths[0]
    par_blk = sum(w.nbytes // n_groups + b.nbytes // n_groups
                  for w, b in zip(packed_w, packed_b))
    act_blk = 4 * batch_tile * max(widths)            # f32 accumulators
    out_blk = 4 * batch_tile * group_size
    est = 2 * x_blk + 2 * par_blk + 4 * act_blk + 2 * out_blk
    vmem_limit = int(min(max(2 * est, 16 << 20), vmem_budget_cap))

    # ---- cost estimate: helps XLA schedule this tiny, latency-bound call ----
    flops = 2 * batch * n_groups * sum((group_size * p) * (group_size * h)
                                       for p, h in layer_dims)
    bytes_accessed = int(x.nbytes
                         + n_tiles * sum(w.nbytes + b.nbytes
                                         for w, b in zip(packed_w, packed_b))
                         + 4 * batch * n_subnets)
    cost = pl.CostEstimate(flops=int(flops), transcendentals=0,
                           bytes_accessed=bytes_accessed)

    kernel = functools.partial(_tensor_layer_kernel, n_layers, activation)

    out3 = pl.pallas_call(
        kernel,
        out_shape=jax.ShapeDtypeStruct((n_groups, batch, group_size), inputs.dtype),
        grid_spec=pltpu.PrefetchScalarGridSpec(
            num_scalar_prefetch=0,
            grid=(n_tiles, n_groups),
            in_specs=in_specs,
            out_specs=out_specs,
        ),
        compiler_params=pltpu.CompilerParams(
            dimension_semantics=("parallel", "parallel"),
            vmem_limit_bytes=vmem_limit,
        ),
        cost_estimate=cost,
    )(x, *flat_params)

    # (1, B, S) -> (B, S) is a free reshape; with multiple groups this is a
    # cheap transpose of a small (n_groups, B, G) array.
    return jnp.transpose(out3, (1, 0, 2)).reshape(batch, n_subnets)


# ----------------------------------------------------------------------------
# Deterministic parameter init (mirrors torch.nn.init.orthogonal_ per subnet,
# biases zero-initialized).
# ----------------------------------------------------------------------------
def _orthogonal(key, rows, cols):
    a = jax.random.normal(key, (max(rows, cols), min(rows, cols)), dtype=jnp.float32)
    q, r = jnp.linalg.qr(a)
    q = q * jnp.sign(jnp.diagonal(r))[None, :]
    if rows < cols:
        q = q.T
    return q[:rows, :cols]


def init_tensor_layer_params(key, n_subnets, subnet_arch, n_input_nodes):
    all_weights, all_biases = [], []
    prev = n_input_nodes
    for n_hidden in list(subnet_arch) + [1]:
        keys = jax.random.split(key, n_subnets + 1)
        key = keys[0]
        w = jnp.stack([_orthogonal(k, prev, n_hidden) for k in keys[1:]])
        b = jnp.zeros((n_subnets, n_hidden), dtype=jnp.float32)
        all_weights.append(w)
        all_biases.append(b)
        prev = n_hidden
    return all_weights, all_biases


# ----------------------------------------------------------------------------
# Pure-JAX reference (direct transcription of the PyTorch forward).
# ----------------------------------------------------------------------------
def tensor_layer_reference(inputs, all_weights, all_biases, activation=jax.nn.relu):
    n_subnets = inputs.shape[0]
    xs = inputs
    n_hidden_layers = len(all_weights) - 1
    for i in range(n_hidden_layers):
        xs = activation(jnp.matmul(xs, all_weights[i])
                        + jnp.reshape(all_biases[i], (n_subnets, 1, -1)))
    out = jnp.matmul(xs, all_weights[-1]) + jnp.reshape(all_biases[-1], (n_subnets, 1, -1))
    return jnp.squeeze(jnp.transpose(out, (1, 0, 2)), axis=2)


if __name__ == "__main__":
    key = jax.random.PRNGKey(0)
    k_x, k_p, k_x2, k_p2 = jax.random.split(key, 4)

    # ---- config 1: module demo size; bf16 MXU operands (default path) -------
    n_subnets, batch, n_input_nodes = 4, 256, 4
    subnet_arch = [32, 16]
    inputs = jax.random.normal(k_x, (n_subnets, batch, n_input_nodes), dtype=jnp.float32)
    weights, biases = init_tensor_layer_params(k_p, n_subnets, subnet_arch, n_input_nodes)
    ref = tensor_layer_reference(inputs, weights, biases)

    out_bf16 = jax.block_until_ready(tensor_layer_forward(inputs, weights, biases))
    assert out_bf16.shape == (batch, n_subnets), out_bf16.shape
    err = float(jnp.max(jnp.abs(out_bf16 - ref)))
    assert err < 2e-1, "bf16 path mismatch vs reference; max abs err = %e" % err

    # ---- config 1 in float32 compute for a tight numerical check ------------
    out_f32 = jax.block_until_ready(
        tensor_layer_forward(inputs, weights, biases, compute_dtype=jnp.float32))
    err32 = float(jnp.max(jnp.abs(out_f32 - ref)))
    assert err32 < 1e-3, "f32 path mismatch vs reference; max abs err = %e" % err32

    # ---- config 2: many subnets -> multi-group diagonal-block path, plus a
    #      ragged (non-divisible) batch to lock in block-padding behaviour. ----
    n_subnets2, batch2, n_input2 = 64, 500, 4
    arch2 = [16, 8]
    inputs2 = jax.random.normal(k_x2, (n_subnets2, batch2, n_input2), dtype=jnp.float32)
    weights2, biases2 = init_tensor_layer_params(k_p2, n_subnets2, arch2, n_input2)
    ref2 = tensor_layer_reference(inputs2, weights2, biases2)

    out2 = jax.block_until_ready(
        tensor_layer_forward(inputs2, weights2, biases2,
                             group_size=32, batch_tile=128))   # 2 groups, ragged tiles
    assert out2.shape == (batch2, n_subnets2), out2.shape
    err2 = float(jnp.max(jnp.abs(out2 - ref2)))
    assert err2 < 2e-1, "multi-group path mismatch vs reference; max abs err = %e" % err2

    print("KERNEL_OK")
</pallas_src>

<mosaic_0001>
module attributes {stable_mosaic.version = 11 : i64} {
  func.func @_tensor_layer_kernel(%arg0: i32, %arg1: i32, %arg2: memref<128x16xbf16, #tpu.memory_space<vmem>>, %arg3: memref<1x16x128xbf16, #tpu.memory_space<vmem>>, %arg4: memref<1x1x128xf32, #tpu.memory_space<vmem>>, %arg5: memref<1x128x64xbf16, #tpu.memory_space<vmem>>, %arg6: memref<1x1x64xf32, #tpu.memory_space<vmem>>, %arg7: memref<1x64x4xbf16, #tpu.memory_space<vmem>>, %arg8: memref<1x1x4xf32, #tpu.memory_space<vmem>>, %arg9: memref<1x128x4xf32, #tpu.memory_space<vmem>>) attributes {dimension_semantics = [#tpu.dimension_semantics<parallel>, #tpu.dimension_semantics<parallel>], iteration_bounds = array<i64: 2, 1>, scalar_prefetch = 0 : i64, scratch_operands = 0 : i64, tpu.core_type = #tpu.core_type<tc>, window_params = [{transform_indices = @transform_0, window_bounds = array<i64: 128, 16>}, {transform_indices = @transform_1, window_bounds = array<i64: 1, 16, 128>}, {transform_indices = @transform_2, window_bounds = array<i64: 1, 1, 128>}, {transform_indices = @transform_3, window_bounds = array<i64: 1, 128, 64>}, {transform_indices = @transform_4, window_bounds = array<i64: 1, 1, 64>}, {transform_indices = @transform_5, window_bounds = array<i64: 1, 64, 4>}, {transform_indices = @transform_6, window_bounds = array<i64: 1, 1, 4>}, {transform_indices = @transform_7, window_bounds = array<i64: 1, 128, 4>}]} {
    %c0 = arith.constant 0 : index
    %c0_0 = arith.constant 0 : index
    %0 = vector.load %arg2[%c0, %c0_0] : memref<128x16xbf16, #tpu.memory_space<vmem>>, vector<128x16xbf16>
    %c0_1 = arith.constant 0 : index
    %c0_2 = arith.constant 0 : index
    %c0_3 = arith.constant 0 : index
    %1 = vector.load %arg3[%c0_1, %c0_2, %c0_3] : memref<1x16x128xbf16, #tpu.memory_space<vmem>>, vector<1x16x128xbf16>
    %2 = vector.shape_cast %1 : vector<1x16x128xbf16> to vector<16x128xbf16>
    %c0_4 = arith.constant 0 : index
    %c0_5 = arith.constant 0 : index
    %c0_6 = arith.constant 0 : index
    %3 = vector.load %arg4[%c0_4, %c0_5, %c0_6] : memref<1x1x128xf32, #tpu.memory_space<vmem>>, vector<1x1x128xf32>
    %4 = vector.shape_cast %3 : vector<1x1x128xf32> to vector<1x128xf32>
    %cst = arith.constant dense<0.000000e+00> : vector<128x128xf32>
    %5 = tpu.matmul %0, %2, %cst {dimension_numbers = #tpu.dot_dimension_numbers<[1], [0], [0], [1], [0, 0, 1, 1], [], []>} : vector<128x16xbf16>, vector<16x128xbf16>, vector<128x128xf32> -> vector<128x128xf32>
    %6 = vector.broadcast %4 : vector<1x128xf32> to vector<128x128xf32>
    %7 = arith.addf %5, %6 : vector<128x128xf32>
    %cst_7 = arith.constant 0.000000e+00 : f32
    %8 = vector.broadcast %cst_7 : f32 to vector<128x128xf32>
    %9 = arith.maximumf %7, %8 : vector<128x128xf32>
    %10 = arith.truncf %9 : vector<128x128xf32> to vector<128x128xbf16>
    %c0_8 = arith.constant 0 : index
    %c0_9 = arith.constant 0 : index
    %c0_10 = arith.constant 0 : index
    %11 = vector.load %arg5[%c0_8, %c0_9, %c0_10] : memref<1x128x64xbf16, #tpu.memory_space<vmem>>, vector<1x128x64xbf16>
    %12 = vector.shape_cast %11 : vector<1x128x64xbf16> to vector<128x64xbf16>
    %c0_11 = arith.constant 0 : index
    %c0_12 = arith.constant 0 : index
    %c0_13 = arith.constant 0 : index
    %13 = vector.load %arg6[%c0_11, %c0_12, %c0_13] : memref<1x1x64xf32, #tpu.memory_space<vmem>>, vector<1x1x64xf32>
    %14 = vector.shape_cast %13 : vector<1x1x64xf32> to vector<1x64xf32>
    %cst_14 = arith.constant dense<0.000000e+00> : vector<128x64xf32>
    %15 = tpu.matmul %10, %12, %cst_14 {dimension_numbers = #tpu.dot_dimension_numbers<[1], [0], [0], [1], [0, 0, 1, 1], [], []>} : vector<128x128xbf16>, vector<128x64xbf16>, vector<128x64xf32> -> vector<128x64xf32>
    %16 = vector.broadcast %14 : vector<1x64xf32> to vector<128x64xf32>
    %17 = arith.addf %15, %16 : vector<128x64xf32>
    %cst_15 = arith.constant 0.000000e+00 : f32
    %18 = vector.broadcast %cst_15 : f32 to vector<128x64xf32>
    %19 = arith.maximumf %17, %18 : vector<128x64xf32>
    %20 = arith.truncf %19 : vector<128x64xf32> to vector<128x64xbf16>
    %c0_16 = arith.constant 0 : index
    %c0_17 = arith.constant 0 : index
    %c0_18 = arith.constant 0 : index
    %21 = vector.load %arg7[%c0_16, %c0_17, %c0_18] : memref<1x64x4xbf16, #tpu.memory_space<vmem>>, vector<1x64x4xbf16>
    %22 = vector.shape_cast %21 : vector<1x64x4xbf16> to vector<64x4xbf16>
    %c0_19 = arith.constant 0 : index
    %c0_20 = arith.constant 0 : index
    %c0_21 = arith.constant 0 : index
    %23 = vector.load %arg8[%c0_19, %c0_20, %c0_21] : memref<1x1x4xf32, #tpu.memory_space<vmem>>, vector<1x1x4xf32>
    %24 = vector.shape_cast %23 : vector<1x1x4xf32> to vector<1x4xf32>
    %cst_22 = arith.constant dense<0.000000e+00> : vector<128x4xf32>
    %25 = tpu.matmul %20, %22, %cst_22 {dimension_numbers = #tpu.dot_dimension_numbers<[1], [0], [0], [1], [0, 0, 1, 1], [], []>} : vector<128x64xbf16>, vector<64x4xbf16>, vector<128x4xf32> -> vector<128x4xf32>
    %26 = vector.broadcast %24 : vector<1x4xf32> to vector<128x4xf32>
    %27 = arith.addf %25, %26 : vector<128x4xf32>
    %c0_23 = arith.constant 0 : index
    %c0_24 = arith.constant 0 : index
    %c0_25 = arith.constant 0 : index
    %28 = vector.load %arg9[%c0_23, %c0_24, %c0_25] : memref<1x128x4xf32, #tpu.memory_space<vmem>>, vector<1x128x4xf32>
    %29 = vector.shape_cast %28 : vector<1x128x4xf32> to vector<128x4xf32>
    %30 = vector.shape_cast %27 : vector<128x4xf32> to vector<1x128x4xf32>
    tpu.vector_store %arg9[%c0_23, %c0_24, %c0_25], %30 {strides = array<i32>} : memref<1x128x4xf32, #tpu.memory_space<vmem>>, vector<1x128x4xf32>,
    return
  }
  func.func @transform_0(%arg0: i32, %arg1: i32) -> (i32, i32) {
    %c0_i32 = arith.constant 0 : i32
    return %arg0, %arg1 : i32, i32
  }
  func.func @transform_1(%arg0: i32, %arg1: i32) -> (i32, i32, i32) {
    %c0_i32 = arith.constant 0 : i32
    %c0_i32_0 = arith.constant 0 : i32
    %c0_i32_1 = arith.constant 0 : i32
    return %arg1, %c0_i32, %c0_i32_0 : i32, i32, i32
  }
  func.func @transform_2(%arg0: i32, %arg1: i32) -> (i32, i32, i32) {
    %c0_i32 = arith.constant 0 : i32
    %c0_i32_0 = arith.constant 0 : i32
    %c0_i32_1 = arith.constant 0 : i32
    return %arg1, %c0_i32, %c0_i32_0 : i32, i32, i32
  }
  func.func @transform_3(%arg0: i32, %arg1: i32) -> (i32, i32, i32) {
    %c0_i32 = arith.constant 0 : i32
    %c0_i32_0 = arith.constant 0 : i32
    %c0_i32_1 = arith.constant 0 : i32
    return %arg1, %c0_i32, %c0_i32_0 : i32, i32, i32
  }
  func.func @transform_4(%arg0: i32, %arg1: i32) -> (i32, i32, i32) {
    %c0_i32 = arith.constant 0 : i32
    %c0_i32_0 = arith.constant 0 : i32
    %c0_i32_1 = arith.constant 0 : i32
    return %arg1, %c0_i32, %c0_i32_0 : i32, i32, i32
  }
  func.func @transform_5(%arg0: i32, %arg1: i32) -> (i32, i32, i32) {
    %c0_i32 = arith.constant 0 : i32
    %c0_i32_0 = arith.constant 0 : i32
    %c0_i32_1 = arith.constant 0 : i32
    return %arg1, %c0_i32, %c0_i32_0 : i32, i32, i32
  }
  func.func @transform_6(%arg0: i32, %arg1: i32) -> (i32, i32, i32) {
    %c0_i32 = arith.constant 0 : i32
    %c0_i32_0 = arith.constant 0 : i32
    %c0_i32_1 = arith.constant 0 : i32
    return %arg1, %c0_i32, %c0_i32_0 : i32, i32, i32
  }
  func.func @transform_7(%arg0: i32, %arg1: i32) -> (i32, i32, i32) {
    %c0_i32 = arith.constant 0 : i32
    %c0_i32_0 = arith.constant 0 : i32
    return %arg1, %arg0, %c0_i32 : i32, i32, i32
  }
}

</mosaic_0001>

<bundles_post_ra>
// kernel: tpu_custom_call.1
= control target key start
LH: loop header
LB: loop body
LE: loop exit
PB: predicated region body
PF: predicated region fallthrough
CT: control target
= control target key end

     0   :  { %s1447_s24 = smov 0   ;;  %s1449_s25 = smov 0   ;;  %s1582_s0 = inlined_call_operand.vmem [shape: bf16[256,16], index: 0, kind: input, shape index: {}]   ;;  %s1583_s1 = inlined_call_operand.vmem [shape: bf16[1,16,128], index: 1, kind: input, shape index: {}]   ;;  %s1584_s2 = inlined_call_operand.vmem [shape: f32[1,1,128], index: 2, kind: input, shape index: {}]   ;;  %s1585_s3 = inlined_call_operand.vmem [shape: bf16[1,128,64], index: 3, kind: input, shape index: {}]   ;;  %s1586_s4 = inlined_call_operand.vmem [shape: f32[1,1,64], index: 4, kind: input, shape index: {}]   ;;  %s1587_s5 = inlined_call_operand.vmem [shape: bf16[1,64,4], index: 5, kind: input, shape index: {}]   ;;  %s1588_s6 = inlined_call_operand.vmem [shape: f32[1,1,4], index: 6, kind: input, shape index: {}]   ;;  %s1589_s7 = inlined_call_operand.vmem [shape: f32[1,256,4], index: 7, kind: output, shape index: {}]  }
   0x1   :  { %s1451_s26 = smov 0  }
   0x2 LB: > { %s29_s27 = sadd.s32 1, %s1401_s25  ;;  %p1180_p0 = scmp.ge.s32.totalorder %s1405_s26, 1  ;;  %s1405_s26 = sphi %s1451_s26, %s17_s26   ;;  %s1401_s25 = sphi %s1449_s25, %s1591_s25   ;;  %s1397_s24 = sphi %s1447_s24, %s1590_s24  }
   0x3   : > { %p31_p1 = scmp.ge.s32.totalorder %s29_s27, 2  ;;  %p311_p2 = scmp.lt.s32.totalorder %s1405_s26, 3 }
   0x5   : > { %s1593_s27 = smov (%p31_p1, %s29_s27), 0  ;;  %p312_p3 = pnand %p1180_p0, %p311_p2 }
   0x6   : > { %v1362_v0 = vld [vmem:[%s1583_s1] sm:$0xff] (!%p312_p3)   ;;  %s1181_s30 = sshll.u32 (!%p312_p3), %s1397_s24, 4  ;;  %v1372_v2 = vld [vmem:[%s1585_s3 + $0x8] sm:$0xff] (!%p312_p3)   ;;  %vm489_vm0 = vcmask (!%p312_p3), 130048   ;;  %v1373_v3 = vld [vmem:[%s1585_s3 + $0x10] sm:$0xff] (!%p312_p3)   ;;  %vm866_vm1 = vcmask (!%p312_p3), 523264  }
   0x7   : > { %315 = sbr.rel (%p312_p3) target bundleno = 705 (0x2c1), region = 48  ;;  %p375_p4 = scmp.lt.s32.totalorder (!%p312_p3), %s1181_s30, 31  ;;  %1264 = vmatprep.subr.bf16.mxu0 (!%p312_p3), %v1362_v0  ;;  %v1371_v1 = vld [vmem:[%s1585_s3] sm:$0xff] (!%p312_p3)   ;;  %v1374_v7 = vld [vmem:[%s1585_s3 + $0x18] sm:$0xff] (!%p312_p3)   ;;  %v1376_v11 = vld [vmem:[%s1585_s3 + $0x28] sm:$0xff] (!%p312_p3)   ;;  %vm988_vm2 = vcmask (!%p312_p3), 31744  }
   0x8   : > { %1265 = vmatpush3.bf16.msra.mxu0 (!%p312_p3), %v1362_v0  ;;  %1282 = vmatprep.subr.bf16.mxu1 (!%p312_p3), %v1371_v1  ;;  %v1375_v8 = vld [vmem:[%s1585_s3 + $0x20] sm:$0xff] (!%p312_p3)   ;;  %v1377_v15 = vld [vmem:[%s1585_s3 + $0x30] sm:$0xff] (!%p312_p3)   ;;  %v1378_v16 = vld [vmem:[%s1585_s3 + $0x38] sm:$0xff] (!%p312_p3)  }
   0x9   : > { %1283 = vmatpush3.bf16.msra.mxu1 (!%p312_p3), %v1371_v1  ;;  %v1379_v17 = vld [vmem:[%s1587_s5] sm:$0xff] (!%p312_p3)   ;;  %v1380_v18 = vld [vmem:[%s1587_s5 + $0x8] sm:$0xff] (!%p312_p3)   ;;  %v1381_v19 = vld [vmem:[%s1587_s5 + $0x10] sm:$0xff] (!%p312_p3)  }
   0xa   : > { %1284 = vmatprep.subr.bf16.mxu1 (!%p312_p3), %v1372_v2  ;;  %1314 = vmatprep.subr.bf16.mxu0 (!%p312_p3), %v1379_v17  ;;  %v1185_v20 = vld [vmem:[%s1584_s2] ss:$0 sm:$0xff] (!%p312_p3) }
   0xd   : > { %1285 = vmatpush3.bf16.msra.mxu1 (!%p312_p3), %v1372_v2 }
   0xe   : > { %s1595_s30 = smov (!%p375_p4, %s1181_s30), 31  ;;  %1286 = vmatprep.subr.bf16.mxu1 %v1373_v3 }
   0xf   : > { %s1182_s12 = sshll.u32 %s1595_s30, 2  ;;  %s1184_s21 = sshll.u32 %s1595_s30, 3 }
  0x10   : > { %s381_s15 = scalar_lea.vmem %s1582_s0, %s1182_s12  ;;  %s1539_s29 = scalar_lea.vmem %s1589_s7, %s1184_s21 }
  0x11   : > { %v1363_v4 = vld [vmem:[%s381_s15] sm:$0xff]   ;;  %v1364_v5 = vld [vmem:[%s381_s15 + $0x8] sm:$0xff]   ;;  %v1365_v6 = vld [vmem:[%s381_s15 + $0x10] sm:$0xff]   ;;  %1287 = vmatpush3.bf16.msra.mxu1 %v1373_v3 }
  0x12   : > { %1266 = vmatprep.mubr.msk.bf16.mxu0 %vm489_vm0, %v1363_v4  ;;  %v1366_v9 = vld [vmem:[%s381_s15 + $0x18] sm:$0xff]   ;;  %1288 = vmatprep.subr.bf16.mxu1 %v1374_v7  ;;  %v1367_v10 = vld [vmem:[%s381_s15 + $0x20] sm:$0xff]   ;;  %v1368_v12 = vld [vmem:[%s381_s15 + $0x28] sm:$0xff]  }
  0x13   : > { %1267 = vmatmul.mubr.msk.bf16.vlgmr.msra.gmra.mrb[0].mxu0 %vm489_vm0, %v1364_v5  ;;  %v1369_v13 = vld [vmem:[%s381_s15 + $0x30] sm:$0xff]   ;;  %v1370_v14 = vld [vmem:[%s381_s15 + $0x38] sm:$0xff]  }
  0x14   : > { %1270 = vmatprep.mubr.msk.bf16.mxu0 %vm489_vm0, %v1365_v6  ;;  %1315 = vmatpush3.bf16.msra.mxu0 %v1379_v17 }
  0x15   : > { %1289 = vmatpush3.bf16.msra.mxu1 %v1374_v7  ;;  %1316 = vmatprep.subr.bf16.mxu0 %v1380_v18 }
  0x16   : > { %1290 = vmatprep.subr.bf16.mxu1 %v1375_v8 }
  0x18   : > { %1317 = vmatpush3.bf16.msra.mxu0 %v1380_v18 }
  0x19   : > { %1291 = vmatpush3.bf16.msra.mxu1 %v1375_v8  ;;  %1318 = vmatprep.subr.bf16.mxu0 %v1381_v19 }
  0x1a   : > { %1292 = vmatprep.subr.bf16.mxu1 %v1376_v11 }
  0x1b   : > { %1271 = vmatmul.mubr.msk.bf16.gmra.mrb[4].mxu0 %vm489_vm0, %v1366_v9 }
  0x1c   : > { %1274 = vmatprep.mubr.msk.bf16.mxu0 %vm489_vm0, %v1367_v10  ;;  %1319 = vmatpush3.bf16.msra.mxu0 %v1381_v19 }
  0x1d   : > { %1293 = vmatpush3.bf16.msra.mxu1 %v1376_v11 }
  0x1e   : > { %1294 = vmatprep.subr.bf16.mxu1 %v1377_v15 }
  0x21   : > { %1295 = vmatpush3.bf16.msra.mxu1 %v1377_v15 }
  0x22   : > { %1296 = vmatprep.subr.bf16.mxu1 %v1378_v16 }
  0x23   : > { %1275 = vmatmul.mubr.msk.bf16.gmra.mrb[8].mxu0 %vm489_vm0, %v1368_v12 }
  0x24   : > { %1278 = vmatprep.mubr.msk.bf16.mxu0 %vm489_vm0, %v1369_v13  ;;  %v1382_v13 = vld [vmem:[%s1587_s5 + $0x18] sm:$0xff]  }
  0x25   : > { %1297 = vmatpush3.bf16.msra.mxu1 %v1378_v16  ;;  %1320 = vmatprep.subr.bf16.mxu0 %v1382_v13 }
  0x26   : > { %1321 = vmatpush3.bf16.msra.mxu0 %v1382_v13 }
  0x2b   : > { %1279 = vmatmul.mubr.msk.bf16.gmra.mrb[12].mxu0 %vm489_vm0, %v1370_v14  ;;  %v1203_v14 = vld [vmem:[%s1586_s4] ss:$0 sm:$0xff] }
  0xe6   : > { %v1268_v21 = vpop.f32.mrb[0].mxu0 }
  0xe7   : > { %v557_v22 = vadd.f32 %v1268_v21, %v1185_v20  ;;  %v548_v23 = vpop.f32.mrb[1].mxu0 }
  0xe8   : > { %v549_v24 = vadd.f32 %v1185_v20, %v548_v23  ;;  %v1269_v25 = vpop.f32.mrb[2].mxu0 }
  0xe9   : > { %v560_v26 = vadd.f32 %v1269_v25, %v1185_v20  ;;  %v551_v27 = vpop.f32.mrb[3].mxu0  ;;  %v613_v29 = vmax.f32 %v557_v22, 0.0 }
  0xea   : > { %v552_v28 = vadd.f32 %v1185_v20, %v551_v27  ;;  %v611_v31 = vmax.f32 %v549_v24, 0.0 }
  0xeb   : > { %v614_v30 = vmax.f32 %v560_v26, 0.0 }
  0xec   : > { %v612_v32 = vmax.f32 %v552_v28, 0.0 }
  0xed   : > { %v628_v33 = vpack.c.bf16 %v614_v30, %v613_v29 }
  0xee   : > { %v1272_v34 = vpop.f32.mrb[4].mxu0  ;;  %v627_v35 = vpack.c.bf16 %v612_v32, %v611_v31 }
  0xef   : > { %v573_v36 = vadd.f32 %v1272_v34, %v1185_v20  ;;  %v564_v37 = vpop.f32.mrb[5].mxu0 }
  0xf0   : > { %v565_v38 = vadd.f32 %v1185_v20, %v564_v37  ;;  %v1273_v39 = vpop.f32.mrb[6].mxu0  ;;  %1298 = vmatprep.mubr.bf16.mxu1 %v627_v35 }
  0xf1   : > { %v576_v40 = vadd.f32 %v1273_v39, %v1185_v20  ;;  %v567_v41 = vpop.f32.mrb[7].mxu0  ;;  %1299 = vmatmul.mubr.bf16.vlgmr.msra.gmra.mrb[0].mxu1 %v628_v33  ;;  %v617_v43 = vmax.f32 %v573_v36, 0.0 }
  0xf2   : > { %v568_v42 = vadd.f32 %v1185_v20, %v567_v41  ;;  %v615_v45 = vmax.f32 %v565_v38, 0.0 }
  0xf3   : > { %v618_v44 = vmax.f32 %v576_v40, 0.0 }
  0xf4   : > { %v616_v46 = vmax.f32 %v568_v42, 0.0 }
  0xf5   : > { %v630_v47 = vpack.c.bf16 %v618_v44, %v617_v43 }
  0xf6   : > { %v629_v48 = vpack.c.bf16 %v616_v46, %v615_v45  ;;  %v1276_v49 = vpop.f32.mrb[8].mxu0 }
  0xf7   : > { %v589_v50 = vadd.f32 %v1276_v49, %v1185_v20  ;;  %v580_v51 = vpop.f32.mrb[9].mxu0 }
  0xf8   : > { %v581_v52 = vadd.f32 %v1185_v20, %v580_v51  ;;  %v1277_v53 = vpop.f32.mrb[10].mxu0  ;;  %1302 = vmatprep.mubr.bf16.mxu1 %v629_v48 }
  0xf9   : > { %v592_v54 = vadd.f32 %v1277_v53, %v1185_v20  ;;  %v583_v55 = vpop.f32.mrb[11].mxu0  ;;  %1303 = vmatmul.mubr.bf16.gmra.mrb[4].mxu1 %v630_v47  ;;  %v621_v57 = vmax.f32 %v589_v50, 0.0 }
  0xfa   : > { %v584_v56 = vadd.f32 %v1185_v20, %v583_v55  ;;  %v619_v59 = vmax.f32 %v581_v52, 0.0 }
  0xfb   : > { %v622_v58 = vmax.f32 %v592_v54, 0.0 }
  0xfc   : > { %v620_v60 = vmax.f32 %v584_v56, 0.0 }
  0xfd   : > { %v632_v61 = vpack.c.bf16 %v622_v58, %v621_v57 }
  0xfe   : > { %v631_v62 = vpack.c.bf16 %v620_v60, %v619_v59  ;;  %v1280_v63 = vpop.f32.mrb[12].mxu0 }
  0xff   : > { %v605_v0 = vadd.f32 %v1280_v63, %v1185_v20  ;;  %v596_v1 = vpop.f32.mrb[13].mxu0 }
 0x100   : > { %v597_v2 = vadd.f32 %v1185_v20, %v596_v1  ;;  %v1281_v3 = vpop.f32.mrb[14].mxu0  ;;  %1306 = vmatprep.mubr.bf16.mxu1 %v631_v62 }
 0x101   : > { %v608_v4 = vadd.f32 %v1281_v3, %v1185_v20  ;;  %v599_v5 = vpop.f32.mrb[15].mxu0  ;;  %1307 = vmatmul.mubr.bf16.gmra.mrb[8].mxu1 %v632_v61  ;;  %v625_v7 = vmax.f32 %v605_v0, 0.0 }
 0x102   : > { %v600_v6 = vadd.f32 %v1185_v20, %v599_v5  ;;  %v623_v9 = vmax.f32 %v597_v2, 0.0 }
 0x103   : > { %v626_v8 = vmax.f32 %v608_v4, 0.0 }
 0x104   : > { %v624_v10 = vmax.f32 %v600_v6, 0.0 }
 0x105   : > { %v634_v11 = vpack.c.bf16 %v626_v8, %v625_v7  ;;  %v1212_v7 = vld [vmem:[%s1588_s6] ss:$0 sm:$0xff] }
 0x106   : > { %v633_v12 = vpack.c.bf16 %v624_v10, %v623_v9 }
 0x108   : > { %1310 = vmatprep.mubr.bf16.mxu1 %v633_v12 }
 0x109   : > { %1311 = vmatmul.mubr.bf16.gmra.mrb[12].mxu1 %v634_v11 }
 0x1c4   : > { %v1300_v15 = vpop.f32.mrb[0].mxu1 }
 0x1c5   : > { %v749_v16 = vadd.f32 %v1300_v15, %v1203_v14  ;;  %v740_v17 = vpop.f32.mrb[1].mxu1 }
 0x1c6   : > { %v741_v18 = vadd.f32 %v1203_v14, %v740_v17  ;;  %v1301_v19 = vpop.f32.mrb[2].mxu1 }
 0x1c7   : > { %v752_v20 = vadd.f32 %v1301_v19, %v1203_v14  ;;  %v743_v21 = vpop.f32.mrb[3].mxu1  ;;  %v805_v23 = vmax.f32 %v749_v16, 0.0 }
 0x1c8   : > { %v744_v22 = vadd.f32 %v1203_v14, %v743_v21  ;;  %v803_v25 = vmax.f32 %v741_v18, 0.0 }
 0x1c9   : > { %v806_v24 = vmax.f32 %v752_v20, 0.0 }
 0x1ca   : > { %v804_v26 = vmax.f32 %v744_v22, 0.0 }
 0x1cb   : > { %v820_v27 = vpack.c.bf16 %v806_v24, %v805_v23 }
 0x1cc   : > { %v819_v28 = vpack.c.bf16 %v804_v26, %v803_v25  ;;  %v1304_v29 = vpop.f32.mrb[4].mxu1 }
 0x1cd   : > { %v765_v30 = vadd.f32 %v1304_v29, %v1203_v14  ;;  %v756_v31 = vpop.f32.mrb[5].mxu1 }
 0x1ce   : > { %v757_v32 = vadd.f32 %v1203_v14, %v756_v31  ;;  %v1305_v33 = vpop.f32.mrb[6].mxu1  ;;  %1322 = vmatprep.mubr.msk.bf16.mxu0 %vm866_vm1, %v819_v28 }
 0x1cf   : > { %v768_v34 = vadd.f32 %v1305_v33, %v1203_v14  ;;  %v759_v35 = vpop.f32.mrb[7].mxu1  ;;  %1323 = vmatmul.mubr.msk.bf16.vlgmr.msra.gmra.mrb[16].mxu0 %vm866_vm1, %v820_v27  ;;  %v809_v37 = vmax.f32 %v765_v30, 0.0 }
 0x1d0   : > { %v760_v36 = vadd.f32 %v1203_v14, %v759_v35  ;;  %v807_v39 = vmax.f32 %v757_v32, 0.0 }
 0x1d1   : > { %v810_v38 = vmax.f32 %v768_v34, 0.0 }
 0x1d2   : > { %v808_v40 = vmax.f32 %v760_v36, 0.0 }
 0x1d3   : > { %v822_v41 = vpack.c.bf16 %v810_v38, %v809_v37 }
 0x1d4   : > { %v821_v42 = vpack.c.bf16 %v808_v40, %v807_v39  ;;  %v1308_v43 = vpop.f32.mrb[8].mxu1 }
 0x1d5   : > { %v781_v44 = vadd.f32 %v1308_v43, %v1203_v14  ;;  %v772_v45 = vpop.f32.mrb[9].mxu1 }
 0x1d6   : > { %v773_v46 = vadd.f32 %v1203_v14, %v772_v45  ;;  %v1309_v47 = vpop.f32.mrb[10].mxu1  ;;  %1326 = vmatprep.mubr.msk.bf16.mxu0 %vm866_vm1, %v821_v42 }
 0x1d7   : > { %v784_v48 = vadd.f32 %v1309_v47, %v1203_v14  ;;  %v775_v49 = vpop.f32.mrb[11].mxu1  ;;  %1327 = vmatmul.mubr.msk.bf16.gmra.mrb[20].mxu0 %vm866_vm1, %v822_v41  ;;  %v813_v51 = vmax.f32 %v781_v44, 0.0 }
 0x1d8   : > { %v776_v50 = vadd.f32 %v1203_v14, %v775_v49  ;;  %v811_v53 = vmax.f32 %v773_v46, 0.0 }
 0x1d9   : > { %v814_v52 = vmax.f32 %v784_v48, 0.0 }
 0x1da   : > { %v812_v54 = vmax.f32 %v776_v50, 0.0 }
 0x1db   : > { %v824_v55 = vpack.c.bf16 %v814_v52, %v813_v51 }
 0x1dc   : > { %v823_v56 = vpack.c.bf16 %v812_v54, %v811_v53  ;;  %v1312_v57 = vpop.f32.mrb[12].mxu1 }
 0x1dd   : > { %v797_v58 = vadd.f32 %v1312_v57, %v1203_v14  ;;  %v788_v59 = vpop.f32.mrb[13].mxu1 }
 0x1de   : > { %v789_v60 = vadd.f32 %v1203_v14, %v788_v59  ;;  %v1313_v61 = vpop.f32.mrb[14].mxu1  ;;  %1330 = vmatprep.mubr.msk.bf16.mxu0 %vm866_vm1, %v823_v56 }
 0x1df   : > { %v800_v62 = vadd.f32 %v1313_v61, %v1203_v14  ;;  %v791_v63 = vpop.f32.mrb[15].mxu1  ;;  %1331 = vmatmul.mubr.msk.bf16.gmra.mrb[24].mxu0 %vm866_vm1, %v824_v55  ;;  %v817_v1 = vmax.f32 %v797_v58, 0.0 }
 0x1e0   : > { %v792_v0 = vadd.f32 %v1203_v14, %v791_v63  ;;  %v815_v3 = vmax.f32 %v789_v60, 0.0 }
 0x1e1   : > { %v818_v2 = vmax.f32 %v800_v62, 0.0 }
 0x1e2   : > { %v816_v4 = vmax.f32 %v792_v0, 0.0 }
 0x1e3   : > { %v826_v5 = vpack.c.bf16 %v818_v2, %v817_v1 }
 0x1e4   : > { %v825_v6 = vpack.c.bf16 %v816_v4, %v815_v3 }
 0x1e6   : > { %1334 = vmatprep.mubr.msk.bf16.mxu0 %vm866_vm1, %v825_v6 }
 0x1e7   : > { %1335 = vmatmul.mubr.msk.bf16.gmra.mrb[28].mxu0 %vm866_vm1, %v826_v5 }
 0x2a2   : > { %v1324_v8 = vpop.f32.mrb[16].mxu0 }
 0x2a3   : > { %v934_v9 = vadd.f32 %v1324_v8, %v1212_v7  ;;  %v925_v10 = vpop.f32.mrb[17].mxu0 }
 0x2a4   : > { %v926_v11 = vadd.f32 %v1212_v7, %v925_v10  ;;  %v1325_v12 = vpop.f32.mrb[18].mxu0 }
 0x2a5   : > { %991 = vst.msk [vmem:[%s1539_s29 + $0x10] sm:$0xff] %vm988_vm2, %v934_v9  ;;  %v937_v13 = vadd.f32 %v1325_v12, %v1212_v7  ;;  %v928_v14 = vpop.f32.mrb[19].mxu0 }
 0x2a6   : > { %989 = vst.msk [vmem:[%s1539_s29] sm:$0xff] %vm988_vm2, %v926_v11  ;;  %v929_v15 = vadd.f32 %v1212_v7, %v928_v14 }
 0x2a7   : > { %992 = vst.msk [vmem:[%s1539_s29 + $0x18] sm:$0xff] %vm988_vm2, %v937_v13 }
 0x2a8   : > { %990 = vst.msk [vmem:[%s1539_s29 + $0x8] sm:$0xff] %vm988_vm2, %v929_v15 }
 0x2aa   : > { %v1328_v16 = vpop.f32.mrb[20].mxu0 }
 0x2ab   : > { %v950_v17 = vadd.f32 %v1328_v16, %v1212_v7  ;;  %v941_v18 = vpop.f32.mrb[21].mxu0 }
 0x2ac   : > { %v942_v19 = vadd.f32 %v1212_v7, %v941_v18  ;;  %v1329_v20 = vpop.f32.mrb[22].mxu0 }
 0x2ad   : > { %995 = vst.msk [vmem:[%s1539_s29 + $0x30] sm:$0xff] %vm988_vm2, %v950_v17  ;;  %v953_v21 = vadd.f32 %v1329_v20, %v1212_v7  ;;  %v944_v22 = vpop.f32.mrb[23].mxu0 }
 0x2ae   : > { %993 = vst.msk [vmem:[%s1539_s29 + $0x20] sm:$0xff] %vm988_vm2, %v942_v19  ;;  %v945_v23 = vadd.f32 %v1212_v7, %v944_v22 }
 0x2af   : > { %996 = vst.msk [vmem:[%s1539_s29 + $0x38] sm:$0xff] %vm988_vm2, %v953_v21 }
 0x2b0   : > { %994 = vst.msk [vmem:[%s1539_s29 + $0x28] sm:$0xff] %vm988_vm2, %v945_v23 }
 0x2b2   : > { %v1332_v24 = vpop.f32.mrb[24].mxu0 }
 0x2b3   : > { %v966_v25 = vadd.f32 %v1332_v24, %v1212_v7  ;;  %v957_v26 = vpop.f32.mrb[25].mxu0 }
 0x2b4   : > { %v958_v27 = vadd.f32 %v1212_v7, %v957_v26  ;;  %v1333_v28 = vpop.f32.mrb[26].mxu0 }
 0x2b5   : > { %999 = vst.msk [vmem:[%s1539_s29 + $0x50] sm:$0xff] %vm988_vm2, %v966_v25  ;;  %v969_v29 = vadd.f32 %v1333_v28, %v1212_v7  ;;  %v960_v30 = vpop.f32.mrb[27].mxu0 }
 0x2b6   : > { %997 = vst.msk [vmem:[%s1539_s29 + $0x40] sm:$0xff] %vm988_vm2, %v958_v27  ;;  %v961_v31 = vadd.f32 %v1212_v7, %v960_v30 }
 0x2b7   : > { %1000 = vst.msk [vmem:[%s1539_s29 + $0x58] sm:$0xff] %vm988_vm2, %v969_v29 }
 0x2b8   : > { %998 = vst.msk [vmem:[%s1539_s29 + $0x48] sm:$0xff] %vm988_vm2, %v961_v31 }
 0x2ba   : > { %v1336_v32 = vpop.f32.mrb[28].mxu0 }
 0x2bb   : > { %v982_v33 = vadd.f32 %v1336_v32, %v1212_v7  ;;  %v973_v34 = vpop.f32.mrb[29].mxu0 }
 0x2bc   : > { %v974_v35 = vadd.f32 %v1212_v7, %v973_v34  ;;  %v1337_v36 = vpop.f32.mrb[30].mxu0 }
 0x2bd   : > { %1003 = vst.msk [vmem:[%s1539_s29 + $0x70] sm:$0xff] %vm988_vm2, %v982_v33  ;;  %v985_v37 = vadd.f32 %v1337_v36, %v1212_v7  ;;  %v976_v38 = vpop.f32.mrb[31].mxu0 }
 0x2be   : > { %1001 = vst.msk [vmem:[%s1539_s29 + $0x60] sm:$0xff] %vm988_vm2, %v974_v35  ;;  %v977_v39 = vadd.f32 %v1212_v7, %v976_v38 }
 0x2bf   : > { %1004 = vst.msk [vmem:[%s1539_s29 + $0x78] sm:$0xff] %vm988_vm2, %v985_v37 }
 0x2c0   : > { %1002 = vst.msk [vmem:[%s1539_s29 + $0x68] sm:$0xff] %vm988_vm2, %v977_v39 }
 0x2c1 PF: > { %s17_s26 = sadd.s32 1, %s1405_s26   ;;  %s1590_s24 = smov %s1401_s25 }
 0x2c2   : > { %p14_p5 = scmp.ge.s32.totalorder %s17_s26, 4   ;;  %s1591_s25 = smov %s1593_s27 }
 0x2c4   :  { %16 = sbr.rel (!%p14_p5) target bundleno = 2 (0x2), region = 96 }

</bundles_post_ra>
